<compile_context>
chip_gen: v6e
topology: v6e:2x2x1
jax: 0.10.0
libtpu: 0.0.40
codegen_flags: <defaults>
</compile_context>

<pallas_src>
import functools

import jax
import jax.numpy as jnp
from jax.experimental import pallas as pl
from jax.experimental.pallas import tpu as pltpu


def _se_kernel(x_ref, w1_ref, w2_ref, o_ref, *, inv_hw):
    # x_ref / o_ref: (1, C, H*W)   w1_ref: (C, C//r)   w2_ref: (C//r, C)
    x = x_ref[...]                                            # input dtype

    # Squeeze: global average pool over spatial positions, accumulated in f32
    # (no full-tensor f32 cast of the slab).
    y = jnp.sum(x, axis=-1, dtype=jnp.float32) * inv_hw       # (1, C) f32

    # Excitation: FC -> ReLU -> FC -> Sigmoid.  These matmuls are tiny
    # ((1,C)x(C,C//r)); MXU utilization is irrelevant — the kernel is
    # HBM-bandwidth-bound on the (B,C,H,W) read + write.
    h = jnp.dot(y, w1_ref[...], preferred_element_type=jnp.float32)
    h = jnp.maximum(h, 0.0)
    s = jnp.dot(h, w2_ref[...], preferred_element_type=jnp.float32)
    s = jax.nn.sigmoid(s)                                     # (1, C) f32

    # Scale: broadcast the per-channel gate over spatial positions (lane axis),
    # in x's dtype so the hot multiply stays narrow.
    gate = s[:, :, None].astype(x.dtype)                      # (1, C, 1)
    o_ref[...] = (x * gate).astype(o_ref.dtype)


def se_block(x, w1, w2):
    """x: (B, C, H, W); w1: (C, C//r); w2: (C//r, C) (pre-transposed)."""
    b, c, h, w = x.shape
    hw = h * w
    hidden = w1.shape[1]
    assert w1.shape == (c, hidden) and w2.shape == (hidden, c)

    # TODO(synk): if a per-batch (C, H*W) slab ever exceeds the per-generation
    # VMEM budget (watch v7x's 64 MiB), switch to a two-phase spatial-tile grid
    # (phase 0 accumulates channel sums into scratch, phase 1 applies the gate).
    x_flat = x.reshape(b, c, hw)   # contiguous reshape; free in the wrapper

    kernel = functools.partial(_se_kernel, inv_hw=1.0 / hw)
    out_flat = pl.pallas_call(
        kernel,
        out_shape=jax.ShapeDtypeStruct((b, c, hw), x.dtype),
        grid=(b,),
        in_specs=[
            pl.BlockSpec((1, c, hw), lambda i: (i, 0, 0)),    # per-batch slab
            pl.BlockSpec((c, hidden), lambda i: (0, 0)),      # VMEM-resident w1
            pl.BlockSpec((hidden, c), lambda i: (0, 0)),      # VMEM-resident w2
        ],
        out_specs=pl.BlockSpec((1, c, hw), lambda i: (i, 0, 0)),
        compiler_params=pltpu.CompilerParams(
            dimension_semantics=("parallel",),  # shard batches across TCs (v7x)
        ),
    )(x_flat, w1, w2)

    return out_flat.reshape(b, c, h, w)


def se_block_ref(x, w1, w2):
    """Pure-JAX reference matching the PyTorch forward."""
    y = jnp.mean(x, axis=(2, 3))                      # AdaptiveAvgPool2d(1)
    y = jnp.maximum(y @ w1, 0.0)                      # Linear + ReLU
    y = jax.nn.sigmoid(y @ w2)                        # Linear + Sigmoid
    return x * y[:, :, None, None]                    # x * y.view(b, c, 1, 1)


if __name__ == "__main__":
    # Small-but-representative shapes: C divisible by reduction (=16) so the
    # hidden dim is >= 1, and H*W = 256 (a multiple of 128) so output stores
    # are lane-dense.
    B, C, H, W = 2, 128, 16, 16
    reduction = 16
    hidden = C // reduction

    key = jax.random.PRNGKey(0)
    kx, k1, k2 = jax.random.split(key, 3)

    x = jax.random.normal(kx, (B, C, H, W), dtype=jnp.float32)
    # Deterministic synthetic weights (already transposed vs. PyTorch storage).
    w1 = jax.random.normal(k1, (C, hidden), dtype=jnp.float32) * 0.1
    w2 = jax.random.normal(k2, (hidden, C), dtype=jnp.float32) * 0.1

    out = se_block(x, w1, w2)
    out = jax.block_until_ready(out)

    ref = se_block_ref(x, w1, w2)
    assert out.shape == (B, C, H, W)
    assert jnp.allclose(out, ref, atol=1e-5, rtol=1e-5), "mismatch vs reference"

    print("KERNEL_OK")
</pallas_src>

<mosaic_0001>
module attributes {stable_mosaic.version = 11 : i64} {
  func.func @_se_kernel(%arg0: i32, %arg1: memref<1x128x256xf32, #tpu.memory_space<vmem>>, %arg2: memref<128x8xf32, #tpu.memory_space<vmem>>, %arg3: memref<8x128xf32, #tpu.memory_space<vmem>>, %arg4: memref<1x128x256xf32, #tpu.memory_space<vmem>>) attributes {dimension_semantics = [#tpu.dimension_semantics<parallel>], iteration_bounds = array<i64: 2>, scalar_prefetch = 0 : i64, scratch_operands = 0 : i64, tpu.core_type = #tpu.core_type<tc>, window_params = [{transform_indices = @transform_0, window_bounds = array<i64: 1, 128, 256>}, {pipeline_mode = #tpu.pipeline_mode<synchronous>, transform_indices = @transform_1, window_bounds = array<i64: 128, 8>}, {pipeline_mode = #tpu.pipeline_mode<synchronous>, transform_indices = @transform_2, window_bounds = array<i64: 8, 128>}, {transform_indices = @transform_3, window_bounds = array<i64: 1, 128, 256>}]} {
    %c0 = arith.constant 0 : index
    %c0_0 = arith.constant 0 : index
    %c0_1 = arith.constant 0 : index
    %0 = vector.load %arg1[%c0, %c0_0, %c0_1] : memref<1x128x256xf32, #tpu.memory_space<vmem>>, vector<1x128x256xf32>
    %cst = arith.constant dense<0.000000e+00> : vector<1x128xf32>
    %1 = vector.multi_reduction <add>, %0, %cst [2] : vector<1x128x256xf32> to vector<1x128xf32>
    %cst_2 = arith.constant 3.906250e-03 : f32
    %2 = vector.broadcast %cst_2 : f32 to vector<1x128xf32>
    %3 = arith.mulf %1, %2 : vector<1x128xf32>
    %c0_3 = arith.constant 0 : index
    %c0_4 = arith.constant 0 : index
    %4 = vector.load %arg2[%c0_3, %c0_4] : memref<128x8xf32, #tpu.memory_space<vmem>>, vector<128x8xf32>
    %cst_5 = arith.constant dense<0.000000e+00> : vector<1x8xf32>
    %5 = tpu.matmul %3, %4, %cst_5 {dimension_numbers = #tpu.dot_dimension_numbers<[1], [0], [0], [1], [0, 0, 1, 1], [], []>} : vector<1x128xf32>, vector<128x8xf32>, vector<1x8xf32> -> vector<1x8xf32>
    %cst_6 = arith.constant 0.000000e+00 : f32
    %6 = vector.broadcast %cst_6 : f32 to vector<1x8xf32>
    %7 = arith.maximumf %5, %6 : vector<1x8xf32>
    %c0_7 = arith.constant 0 : index
    %c0_8 = arith.constant 0 : index
    %8 = vector.load %arg3[%c0_7, %c0_8] : memref<8x128xf32, #tpu.memory_space<vmem>>, vector<8x128xf32>
    %cst_9 = arith.constant dense<0.000000e+00> : vector<1x128xf32>
    %9 = tpu.matmul %7, %8, %cst_9 {dimension_numbers = #tpu.dot_dimension_numbers<[1], [0], [0], [1], [0, 0, 1, 1], [], []>} : vector<1x8xf32>, vector<8x128xf32>, vector<1x128xf32> -> vector<1x128xf32>
    %10 = arith.negf %9 : vector<1x128xf32>
    %11 = math.exp %10 : vector<1x128xf32>
    %cst_10 = arith.constant 1.000000e+00 : f32
    %12 = vector.broadcast %cst_10 : f32 to vector<1x128xf32>
    %13 = arith.addf %12, %11 : vector<1x128xf32>
    %14 = arith.divf %12, %13 : vector<1x128xf32>
    %15 = vector.shape_cast %14 : vector<1x128xf32> to vector<1x128x1xf32>
    %16 = vector.broadcast %15 : vector<1x128x1xf32> to vector<1x128x256xf32>
    %17 = arith.mulf %0, %16 : vector<1x128x256xf32>
    %c0_11 = arith.constant 0 : index
    %c0_12 = arith.constant 0 : index
    %c0_13 = arith.constant 0 : index
    %18 = vector.load %arg4[%c0_11, %c0_12, %c0_13] : memref<1x128x256xf32, #tpu.memory_space<vmem>>, vector<1x128x256xf32>
    tpu.vector_store %arg4[%c0_11, %c0_12, %c0_13], %17 {strides = array<i32>} : memref<1x128x256xf32, #tpu.memory_space<vmem>>, vector<1x128x256xf32>,
    return
  }
  func.func @transform_0(%arg0: i32) -> (i32, i32, i32) {
    %c0_i32 = arith.constant 0 : i32
    %c0_i32_0 = arith.constant 0 : i32
    %c0_i32_1 = arith.constant 0 : i32
    return %arg0, %c0_i32, %c0_i32_0 : i32, i32, i32
  }
  func.func @transform_1(%arg0: i32) -> (i32, i32) {
    %c0_i32 = arith.constant 0 : i32
    %c0_i32_0 = arith.constant 0 : i32
    %c0_i32_1 = arith.constant 0 : i32
    return %c0_i32, %c0_i32_0 : i32, i32
  }
  func.func @transform_2(%arg0: i32) -> (i32, i32) {
    %c0_i32 = arith.constant 0 : i32
    %c0_i32_0 = arith.constant 0 : i32
    %c0_i32_1 = arith.constant 0 : i32
    return %c0_i32, %c0_i32_0 : i32, i32
  }
  func.func @transform_3(%arg0: i32) -> (i32, i32, i32) {
    %c0_i32 = arith.constant 0 : i32
    %c0_i32_0 = arith.constant 0 : i32
    %c0_i32_1 = arith.constant 0 : i32
    return %arg0, %c0_i32, %c0_i32_0 : i32, i32, i32
  }
}

</mosaic_0001>

<bundles_post_ra>
// kernel: tpu_custom_call.1
= control target key start
LH: loop header
LB: loop body
LE: loop exit
PB: predicated region body
PF: predicated region fallthrough
CT: control target
= control target key end

     0   :  { %8 = vsyncpa [#allocation3], 0  ;;  %s1517_s0 = inlined_call_operand.hbm [shape: f32[2,128,256], index: 0, kind: input, shape index: {}]   ;;  %s1518_s1 = inlined_call_operand.vmem [shape: f32[128,8], index: 1, kind: input, shape index: {}]   ;;  %s1519_s2 = inlined_call_operand.vmem [shape: f32[8,128], index: 2, kind: input, shape index: {}]   ;;  %s1520_s3 = inlined_call_operand.hbm [shape: f32[2,128,256], index: 3, kind: output, shape index: {}]  }
   0x1   :  { %10 = vsyncpa [#allocation3 + $0x1], 0 }
   0x2   :  { %11 = vsyncpa [#allocation4], 0 }
   0x3   :  { %13 = vsyncpa [#allocation4 + $0x1], 0  ;;  %s1054_s12 = smov 0   ;;  %s1056_s13 = smov 0  }
   0x4   :  { %s1058_s14 = smov 0   ;;  %s1060_s15 = smov 0  }
   0x5 LB: > { %s1075_s16 = sadd.s32 4294967295, %s1024_s15   ;;  %s799_s17 = sadd.s32 4294967294, %s1024_s15   ;;  %s1024_s15 = sphi %s1060_s15, %s1535_s15   ;;  %s1020_s14 = sphi %s1058_s14, %s1534_s14   ;;  %s1016_s13 = sphi %s1056_s13, %s1533_s13   ;;  %s1012_s12 = sphi %s1054_s12, %s1532_s12  }
   0x6   : > { %s1079_s18 = sadd.s32 1, %s1024_s15   ;;  %s26_s19 = sadd.s32 1, %s1020_s14 }
   0x7   : > { %s23_s20 = ssub.s32 %s1024_s15, %s1079_s18  ;;  %p33_p0 = scmp.ne.s32.totalorder %s1020_s14, %s1016_s13 }
   0x8   : > { %p24_p1 = scmp.eq.s32.totalorder %s23_s20, 0  ;;  %p34_p2 = scmp.eq.s32.totalorder %s1024_s15, 0 }
   0x9   : > { %p39_p3 = scmp.ne.s32.totalorder %s1016_s13, %s1012_s12  ;;  %p40_p4 = scmp.eq.s32.totalorder %s1075_s16, 0 }
   0xa   : > { %s1091_s21 = scalar_select %p24_p1, %s1020_s14, %s26_s19  }
   0xb   : > { %p1093_p5 = por %p34_p2, %p33_p0  ;;  %p1097_p6 = por %p40_p4, %p39_p3 }
   0xc   : > { %p105_p7 = scmp.eq.s32.totalorder %s1075_s16, 1  ;;  %p111_p8 = scmp.eq.s32.totalorder %s799_s17, 1 }
   0xd   : > { %s1524_s23 = scalar_select %p1097_p6, 1, 0 }
   0xe   : > { %p888_p10 = scmp.lt.s32.totalorder %s1024_s15, 2  ;;  %p1104_p11 = por %p105_p7, %p33_p0 }
   0xf   : > { %p1108_p12 = por %p111_p8, %p39_p3  ;;  %s137_s26 = sand.u32 1, %s1020_s14  }
  0x10   : > { %s1525_s24 = scalar_select %p1104_p11, 1, 0 }
  0x11   : > { %s1526_s25 = scalar_select %p1108_p12, 1, 0 }
  0x12   : > { %s815_s27 = sshll.u32 %s1024_s15, 12  ;;  %s802_s28 = sshll.u32 %s137_s26, 8 }
  0x13   : > { %s1117_s4 = scalar_lea.hbm %s1517_s0, %s815_s27  ;;  %s141_s5 = scalar_lea.vmem [#allocation2], %s802_s28 }
  0x14   : > { %s148_s6 = sshll.u32 %s141_s5, 4  ;;  %p1121_p13 = pnand %p888_p10, %p1093_p5  ;;  %s1125_s6 = int_to_ptr.vmem [resolvable:$true] %s148_s6 }
  0x15   : > { %s1127_s8 = scalar_lea.sflag [#allocation3], %s137_s26  ;;  %s932_s9 = scalar_lea.hbm %s1117_s4, 4096 }
  0x16   : > { %p933_p0 = scmp.ne.s32.totalorder %s1117_s4, %s932_s9  ;;  %p934_p1 = pneg %p1121_p13 }
  0x17   : > { %s937_s17 = scalar_lea.hbm %s1517_s0, 8192  ;;  %p938_p4 = scmp.lt.s32.totalorder %s1117_s4, %s1517_s0 }
  0x18   : > { %p935_p2 = pnand %p934_p1, %p933_p0  ;;  %p939_p5 = scmp.lt.s32.totalorder %s937_s17, %s932_s9 }
  0x1a   : > { %p936_p3 = pneg %p935_p2  ;;  %p940_p7 = por %p939_p5, %p938_p4 }
  0x1c   : > { %p941_p8 = pnand %p940_p7, %p936_p3 }
  0x1e   : > { %944 = shalt.err (!%p941_p8)
}
  0x1f   : > { %s945_s22 = scalar_lea.vmem %s1125_s6, 4096  ;;  %s1026_s26 = smov [#allocation2]  }
  0x20   : > { %p946_p10 = scmp.ne.s32.totalorder %s1125_s6, %s945_s22  ;;  %s950_s27 = sshll.u32 %s1026_s26, 4  ;;  %s951_s27 = int_to_ptr.vmem [resolvable:$false] %s950_s27 }
  0x21   : > { %s952_s28 = scalar_lea.vmem %s951_s27, 8192  ;;  %p953_p2 = scmp.lt.s32.totalorder %s1125_s6, %s951_s27 }
  0x22   : > { %p948_p9 = pnand %p946_p10, %p934_p1  ;;  %p954_p12 = scmp.lt.s32.totalorder %s952_s28, %s945_s22 }
  0x24   : > { %p949_p0 = pneg %p948_p9  ;;  %p955_p11 = por %p954_p12, %p953_p2 }
  0x26   : > { %p956_p6 = pnand %p955_p11, %p949_p0 }
  0x28   : > { %959 = shalt.err (!%p956_p6)
}
  0x29   : > { %s1027_s29 = smov 256   ;;  %s1028_s30 = smov 16  }
  0x2a   : > { %883 = dma.hbm_to_vmem [thread:$0]  (!%p1121_p13), %s1117_s4, 4096, %s1125_s6, %s1127_s8, %s1027_s29, %s1027_s29, %s1028_s30  }
  0x2b   : > { %p805_p9 = scmp.ge.s32.totalorder %s1024_s15, 1  ;;  %p156_p1 = scmp.lt.s32.totalorder %s1024_s15, 3 }
  0x2d   : > { %p157_p3 = pnand %p805_p9, %p156_p1 }
  0x2e   : > { %s1151_s5 = sand.u32 (!%p157_p3), 1, %s1016_s13   ;;  %p1528_p6 = scmp.ne.s32.totalorder (!%p157_p3), %s1524_s23, 0 }
  0x2f   : > { %160 = sbr.rel (%p157_p3) target bundleno = 813 (0x32d), region = 32  ;;  %s806_s9 = sshll.u32 (!%p157_p3), %s1151_s5, 8 }
  0x30   : > { %s163_s10 = scalar_lea.sflag (!%p157_p3), [#allocation3], %s1151_s5  ;;  %s1157_s11 = scalar_lea.vmem (!%p157_p3), [#allocation2], %s806_s9 }
  0x34   : > { %1003 = dma.done.wait (%p1528_p6), %s163_s10, 4096  }
  0x35   : > { %1005 = vsyncadd (%p1528_p6), %s163_s10, 4294963200  ;;  %v1164_v0 = vld [vmem:[%s1157_s11] sm:$0xff]  ;;  %v1167_v1 = vld [vmem:[%s1157_s11 + $0x8] sm:$0xff]  ;;  %v1029_v29 = vmov 0.0   ;;  %vm1030_vm0 = vmmov 0   ;;  %vm328_vm1 = vcmask 130112  }
  0x36   : > { %v1170_v2 = vld [vmem:[%s1157_s11 + $0x20] sm:$0xff]  ;;  %v221_v3 = vadd.f32 %v1167_v1, %v1164_v0  ;;  %v1175_v4 = vld [vmem:[%s1157_s11 + $0x28] sm:$0xff]  ;;  %v1178_v5 = vld [vmem:[%s1157_s11 + $0x10] sm:$0xff]  ;;  %836 = vmatprep.subr.mxu0 %v1029_v29  ;;  %871 = vmatprep.subr.mxu1 %v1029_v29  ;;  %vm335_vm2 = vcmask 195712   ;;  %vm342_vm3 = vcmask 261312   ;;  %vm349_vm4 = vcmask 326912  }
  0x37   : > { %v1181_v6 = vld [vmem:[%s1157_s11 + $0x18] sm:$0xff]  ;;  %v227_v7 = vadd.f32 %v1175_v4, %v1170_v2  ;;  %v1186_v8 = vld [vmem:[%s1157_s11 + $0x30] sm:$0xff]  ;;  %v1196_v12 = vld [vmem:[%s1157_s11 + $0x40] sm:$0xff]  ;;  %868 = vmatprep.mubr.msk.f32.mxu0 %vm1030_vm0, %v1029_v29  ;;  %873 = vmatprep.mubr.msk.f32.mxu1 %vm1030_vm0, %v1029_v29  ;;  %vm356_vm5 = vcmask 392512   ;;  %vm363_vm6 = vcmask 458112   ;;  %vm370_vm7 = vcmask 523712  }
  0x38   : > { %v1189_v9 = vld [vmem:[%s1157_s11 + $0x38] sm:$0xff]  ;;  %222 = vadd.xlane.f32.xlu0 %v221_v3  ;;  %v224_v10 = vadd.f32 %v1181_v6, %v1178_v5  ;;  %v1199_v13 = vld [vmem:[%s1157_s11 + $0x48] sm:$0xff]  ;;  %v1202_v14 = vld [vmem:[%s1157_s11 + $0x50] sm:$0xff]  ;;  %vm377_vm8 = vcmask 589312   ;;  %vm384_vm9 = vcmask 654912   ;;  %vm391_vm10 = vcmask 720512  }
  0x39   : > { %228 = vadd.xlane.f32.xlu1 %v227_v7  ;;  %v230_v11 = vadd.f32 %v1189_v9, %v1186_v8  ;;  %v1205_v15 = vld [vmem:[%s1157_s11 + $0x58] sm:$0xff]  ;;  %v233_v16 = vadd.f32 %v1199_v13, %v1196_v12  ;;  %v1212_v18 = vld [vmem:[%s1157_s11 + $0x60] sm:$0xff]  ;;  %v1215_v19 = vld [vmem:[%s1157_s11 + $0x68] sm:$0xff]  ;;  %v317_v7 = vlaneseq  ;;  %vm398_vm11 = vcmask 786112   ;;  %s1405_s6 = scalar_lea.vmem [#allocation5], %s806_s9  ;;  %s816_s9 = sshll.u32 %s1075_s16, 12 }
  0x3a   : > { %v236_v17 = vadd.f32 %v1205_v15, %v1202_v14  ;;  %v1218_v20 = vld [vmem:[%s1157_s11 + $0x70] sm:$0xff]  ;;  %v1221_v21 = vld [vmem:[%s1157_s11 + $0x78] sm:$0xff]  ;;  %v239_v22 = vadd.f32 %v1215_v19, %v1212_v18  ;;  %v1228_v24 = vld [vmem:[%s1157_s11 + $0x80] sm:$0xff]  ;;  %vm405_vm12 = vcmask 851712   ;;  %vm412_vm13 = vcmask 917312   ;;  %s726_s7 = sshll.u32 %s1405_s6, 4  ;;  %s1468_s19 = scalar_lea.hbm %s1520_s3, %s816_s9  ;;  %s1470_s7 = int_to_ptr.vmem [resolvable:$true] %s726_s7 }
  0x3b   : > { %v242_v23 = vadd.f32 %v1221_v21, %v1218_v20  ;;  %v1231_v25 = vld [vmem:[%s1157_s11 + $0x88] sm:$0xff]  ;;  %v1234_v26 = vld [vmem:[%s1157_s11 + $0x90] sm:$0xff]  ;;  %v1237_v27 = vld [vmem:[%s1157_s11 + $0x98] sm:$0xff]  ;;  %vm419_vm14 = vcmask 982912   ;;  %vm426_vm15 = vcmask 1048512   ;;  %vm501_vm0 = vcmask 64512  }
  0x3c   : > { %225 = vadd.xlane.f32.xlu0 %v224_v10  ;;  %v245_v28 = vadd.f32 %v1231_v25, %v1228_v24  ;;  %v300_v30 = vld [vmem:[%s1518_s1 + $0x78] sm:$0xff]  ;;  %v248_v31 = vadd.f32 %v1237_v27, %v1234_v26  ;;  %v1248_v32 = vld [vmem:[%s1157_s11 + $0xa0] sm:$0xff]  ;;  %v1251_v33 = vld [vmem:[%s1157_s11 + $0xa8] sm:$0xff]  ;;  %v1358_v10 = vand.u32 127, %v317_v7  ;;  %s713_s16 = scalar_lea.sflag [#allocation4], %s1151_s5  ;;  %s960_s20 = scalar_lea.vmem %s1470_s7, 4096 }
  0x3d   : > { %231 = vadd.xlane.f32.xlu1 %v230_v11  ;;  %837 = vmatpush3.msra.mxu0 %v300_v30  ;;  %v1254_v34 = vld [vmem:[%s1157_s11 + $0xb0] sm:$0xff]  ;;  %v1257_v35 = vld [vmem:[%s1157_s11 + $0xb8] sm:$0xff]  ;;  %v251_v37 = vadd.f32 %v1251_v33, %v1248_v32  ;;  %v298_v38 = vld [vmem:[%s1518_s1 + $0x68] sm:$0xff]  ;;  %v1360_v11 = vshrl.u32 %v317_v7, 7  ;;  %p961_p11 = scmp.ne.s32.totalorder %s1470_s7, %s960_s20  ;;  %p1529_p12 = scmp.ne.s32.totalorder %s1525_s24, 0 }
  0x3e   : > { %838 = vmatprep.subr.mxu0 %v1029_v29  ;;  %v299_v36 = vld [vmem:[%s1518_s1 + $0x70] sm:$0xff]  ;;  %v254_v39 = vadd.f32 %v1257_v35, %v1254_v34  ;;  %v1273_v40 = vld [vmem:[%s1157_s11 + $0xc0] sm:$0xff]  ;;  %v1276_v41 = vld [vmem:[%s1157_s11 + $0xc8] sm:$0xff]  ;;  %s1031_s22 = smov [#allocation5]  }
  0x3f   : > { %839 = vmatpush3.msra.mxu0 %v299_v36  ;;  %v1279_v42 = vld [vmem:[%s1157_s11 + $0xd0] sm:$0xff]  ;;  %v1282_v43 = vld [vmem:[%s1157_s11 + $0xd8] sm:$0xff]  ;;  %v297_v44 = vld [vmem:[%s1518_s1 + $0x60] sm:$0xff]  ;;  %v257_v45 = vadd.f32 %v1276_v41, %v1273_v40  ;;  %v321_v30 = vsub.s32 %v1358_v10, %v1360_v11  ;;  %p962_p13 = pnand %p961_p11, %p1529_p12  ;;  %s964_s26 = sshll.u32 %s1031_s22, 4  ;;  %s965_s26 = int_to_ptr.vmem [resolvable:$false] %s964_s26 }
  0x40   : > { %234 = vadd.xlane.f32.xlu0 %v233_v16  ;;  %840 = vmatprep.subr.mxu0 %v1029_v29  ;;  %v296_v46 = vld [vmem:[%s1518_s1 + $0x58] sm:$0xff]  ;;  %v260_v47 = vadd.f32 %v1282_v43, %v1279_v42  ;;  %v1297_v48 = vld [vmem:[%s1157_s11 + $0xe0] sm:$0xff]  ;;  %v1300_v49 = vld [vmem:[%s1157_s11 + $0xe8] sm:$0xff]  ;;  %v323_v16 = vadd.s32 4294967288, %v1358_v10  ;;  %s966_s27 = scalar_lea.vmem %s965_s26, 8192  ;;  %p967_p5 = scmp.lt.s32.totalorder %s1470_s7, %s965_s26 }
  0x41   : > { %237 = vadd.xlane.f32.xlu1 %v236_v17  ;;  %841 = vmatpush3.msra.mxu0 %v298_v38  ;;  %v1303_v50 = vld [vmem:[%s1157_s11 + $0xf0] sm:$0xff]  ;;  %v1306_v51 = vld [vmem:[%s1157_s11 + $0xf8] sm:$0xff]  ;;  %v263_v53 = vadd.f32 %v1300_v49, %v1297_v48  ;;  %v294_v54 = vld [vmem:[%s1518_s1 + $0x48] sm:$0xff]  ;;  %p963_p4 = pneg %p962_p13  ;;  %p968_p7 = scmp.lt.s32.totalorder %s966_s27, %s960_s20 }
  0x42   : > { %842 = vmatprep.subr.mxu0 %v1029_v29  ;;  %v295_v52 = vld [vmem:[%s1518_s1 + $0x50] sm:$0xff]  ;;  %v266_v55 = vadd.f32 %v1306_v51, %v1303_v50  ;;  %v293_v56 = vld [vmem:[%s1518_s1 + $0x40] sm:$0xff]  ;;  %v292_v57 = vld [vmem:[%s1518_s1 + $0x38] sm:$0xff]  ;;  %v326_v36 = vsub.s32 %v323_v16, %v1360_v11 }
  0x43   : > { %843 = vmatpush3.msra.mxu0 %v297_v44  ;;  %v291_v58 = vld [vmem:[%s1518_s1 + $0x30] sm:$0xff]  ;;  %v290_v59 = vld [vmem:[%s1518_s1 + $0x28] sm:$0xff]  ;;  %v289_v60 = vld [vmem:[%s1518_s1 + $0x20] sm:$0xff]  ;;  %p969_p8 = por %p968_p7, %p967_p5 }
  0x44   : > { %240 = vadd.xlane.f32.xlu0 %v239_v22  ;;  %844 = vmatprep.subr.mxu0 %v1029_v29  ;;  %v288_v61 = vld [vmem:[%s1518_s1 + $0x18] sm:$0xff]  ;;  %v287_v62 = vld [vmem:[%s1518_s1 + $0x10] sm:$0xff]  ;;  %v286_v63 = vld [vmem:[%s1518_s1 + $0x8] sm:$0xff]  ;;  %v330_v22 = vadd.s32 4294967280, %v1358_v10 }
  0x45   : > { %243 = vadd.xlane.f32.xlu1 %v242_v23  ;;  %845 = vmatpush3.msra.mxu0 %v296_v46  ;;  %v285_v3 = vld [vmem:[%s1518_s1] sm:$0xff]  ;;  %v337_v23 = vadd.s32 4294967272, %v1358_v10  ;;  %p970_p10 = pnand %p969_p8, %p963_p4 }
  0x46   : > { %846 = vmatprep.subr.mxu0 %v1029_v29 }
  0x47   : > { %847 = vmatpush3.msra.mxu0 %v295_v52  ;;  %v340_v44 = vsub.s32 %v337_v23, %v1360_v11 }
  0x48   : > { %246 = vadd.xlane.f32.xlu0 %v245_v28  ;;  %848 = vmatprep.subr.mxu0 %v1029_v29 }
  0x49   : > { %249 = vadd.xlane.f32.xlu1 %v248_v31  ;;  %849 = vmatpush3.msra.mxu0 %v294_v54 }
  0x4a   : > { %850 = vmatprep.subr.mxu0 %v1029_v29 }
  0x4b   : > { %851 = vmatpush3.msra.mxu0 %v293_v56  ;;  %v358_v56 = vadd.s32 4294967248, %v1358_v10 }
  0x4c   : > { %252 = vadd.xlane.f32.xlu0 %v251_v37  ;;  %852 = vmatprep.subr.mxu0 %v1029_v29  ;;  %v333_v37 = vsub.s32 %v330_v22, %v1360_v11 }
  0x4d   : > { %255 = vadd.xlane.f32.xlu1 %v254_v39  ;;  %853 = vmatpush3.msra.mxu0 %v292_v57  ;;  %v361_v23 = vsub.s32 %v358_v56, %v1360_v11  ;;  %v393_v56 = vadd.s32 4294967208, %v1358_v10 }
  0x4e   : > { %854 = vmatprep.subr.mxu0 %v1029_v29 }
  0x4f   : > { %855 = vmatpush3.msra.mxu0 %v291_v58 }
  0x50   : > { %258 = vadd.xlane.f32.xlu0 %v257_v45  ;;  %856 = vmatprep.subr.mxu0 %v1029_v29  ;;  %v351_v45 = vadd.s32 4294967256, %v1358_v10 }
  0x51   : > { %261 = vadd.xlane.f32.xlu1 %v260_v47  ;;  %857 = vmatpush3.msra.mxu0 %v290_v59 }
  0x52   : > { %858 = vmatprep.subr.mxu0 %v1029_v29 }
  0x53   : > { %859 = vmatpush3.msra.mxu0 %v289_v60  ;;  %v354_v60 = vsub.s32 %v351_v45, %v1360_v11 }
  0x54   : > { %264 = vadd.xlane.f32.xlu0 %v263_v53  ;;  %860 = vmatprep.subr.mxu0 %v1029_v29 }
  0x55   : > { %267 = vadd.xlane.f32.xlu1 %v266_v55  ;;  %861 = vmatpush3.msra.mxu0 %v288_v61  ;;  %v365_v61 = vadd.s32 4294967240, %v1358_v10 }
  0x56   : > { %862 = vmatprep.subr.mxu0 %v1029_v29 }
  0x57   : > { %863 = vmatpush3.msra.mxu0 %v287_v62 }
  0x58   : > { %864 = vmatprep.subr.mxu0 %v1029_v29 }
  0x59   : > { %865 = vmatpush3.msra.mxu0 %v286_v63 }
  0x5a   : > { %866 = vmatprep.subr.mxu0 %v1029_v29  ;;  %v344_v29 = vadd.s32 4294967264, %v1358_v10 }
  0x5b   : > { %867 = vmatpush3.msra.mxu0 %v285_v3 }
  0x5c   : > { %v347_v55 = vsub.s32 %v344_v29, %v1360_v11  ;;  %v379_v29 = vadd.s32 4294967224, %v1358_v10 }
  0xc1   : > { %v223_v17 = vpop.xlane.xlu0 %222 }
  0xc2   : > { %v229_v28 = vpop.xlane.xlu1 %228  ;;  %v269_v31 = vmul.f32 0.00390625, %v223_v17 }
  0xc3   : > { %v271_v38 = vmul.f32 0.00390625, %v229_v28  ;;  %v372_v28 = vadd.s32 4294967232, %v1358_v10 }
  0xc4   : > { %v322_v53 = vrot.slane %v269_v31, %v321_v30 }
  0xc5   : > { %v226_v39 = vpop.xlane.xlu0 %225  ;;  %v334_v57 = vrot.slane %v271_v38, %v333_v37 }
  0xc6   : > { %v270_v46 = vmul.f32 0.00390625, %v226_v39  ;;  %v232_v47 = vpop.xlane.xlu1 %231 }
  0xc7   : > { %v272_v52 = vmul.f32 0.00390625, %v232_v47  ;;  %v386_v47 = vadd.s32 4294967216, %v1358_v10 }
  0xc8   : > { %v327_v54 = vrot.slane %v270_v46, %v326_v36  ;;  %v368_v36 = vsub.s32 %v365_v61, %v1360_v11  ;;  %v375_v46 = vsub.s32 %v372_v28, %v1360_v11 }
  0xc9   : > { %v341_v58 = vrot.slane %v272_v52, %v340_v44  ;;  %v235_v59 = vpop.xlane.xlu0 %234 }
  0xca   : > { %v329_v62 = vsel %vm328_vm1, %v327_v54, %v322_v53  ;;  %v273_v63 = vmul.f32 0.00390625, %v235_v59  ;;  %v238_v3 = vpop.xlane.xlu1 %237 }
  0xcb   : > { %v336_v7 = vsel %vm335_vm2, %v334_v57, %v329_v62  ;;  %v274_v16 = vmul.f32 0.00390625, %v238_v3  ;;  %v389_v62 = vsub.s32 %v386_v47, %v1360_v11 }
  0xcc   : > { %v343_v17 = vsel %vm342_vm3, %v341_v58, %v336_v7  ;;  %v348_v22 = vrot.slane %v273_v63, %v347_v55  ;;  %v382_v55 = vsub.s32 %v379_v29, %v1360_v11  ;;  %v400_v63 = vadd.s32 4294967200, %v1358_v10 }
  0xcd   : > { %v355_v30 = vrot.slane %v274_v16, %v354_v60  ;;  %v241_v31 = vpop.xlane.xlu0 %240 }
  0xce   : > { %v350_v37 = vsel %vm349_vm4, %v348_v22, %v343_v17  ;;  %v275_v38 = vmul.f32 0.00390625, %v241_v31  ;;  %v244_v39 = vpop.xlane.xlu1 %243  ;;  %v396_v17 = vsub.s32 %v393_v56, %v1360_v11  ;;  %v407_v22 = vadd.s32 4294967192, %v1358_v10 }
  0xcf   : > { %v276_v44 = vmul.f32 0.00390625, %v244_v39  ;;  %v357_v52 = vsel %vm356_vm5, %v355_v30, %v350_v37  ;;  %v403_v29 = vsub.s32 %v400_v63, %v1360_v11  ;;  %v414_v37 = vadd.s32 4294967184, %v1358_v10 }
  0xd0   : > { %v362_v45 = vrot.slane %v275_v38, %v361_v23 }
  0xd1   : > { %v369_v53 = vrot.slane %v276_v44, %v368_v36  ;;  %v247_v54 = vpop.xlane.xlu0 %246  ;;  %v417_v56 = vsub.s32 %v414_v37, %v1360_v11 }
  0xd2   : > { %v364_v57 = vsel %vm363_vm6, %v362_v45, %v357_v52  ;;  %v277_v58 = vmul.f32 0.00390625, %v247_v54  ;;  %v250_v59 = vpop.xlane.xlu1 %249  ;;  %v410_v45 = vsub.s32 %v407_v22, %v1360_v11 }
  0xd3   : > { %v278_v60 = vmul.f32 0.00390625, %v250_v59  ;;  %v371_v3 = vsel %vm370_vm7, %v369_v53, %v364_v57 }
  0xd4   : > { %v376_v61 = vrot.slane %v277_v58, %v375_v46  ;;  %v421_v46 = vadd.s32 4294967176, %v1358_v10 }
  0xd5   : > { %v383_v7 = vrot.slane %v278_v60, %v382_v55  ;;  %v253_v16 = vpop.xlane.xlu0 %252 }
  0xd6   : > { %v378_v23 = vsel %vm377_vm8, %v376_v61, %v371_v3  ;;  %v279_v28 = vmul.f32 0.00390625, %v253_v16  ;;  %v256_v30 = vpop.xlane.xlu1 %255  ;;  %v424_v60 = vsub.s32 %v421_v46, %v1360_v11 }
  0xd7   : > { %v280_v31 = vmul.f32 0.00390625, %v256_v30  ;;  %v385_v38 = vsel %vm384_vm9, %v383_v7, %v378_v23  ;;  %v500_v23 = vld [vmem:[%s1519_s2] sm:$0xff] }
  0xd8   : > { %v390_v36 = vrot.slane %v279_v28, %v389_v62  ;;  %872 = vmatpush3.msra.mxu1 %v500_v23 }
  0xd9   : > { %v397_v39 = vrot.slane %v280_v31, %v396_v17  ;;  %v259_v44 = vpop.xlane.xlu0 %258 }
  0xda   : > { %v392_v47 = vsel %vm391_vm10, %v390_v36, %v385_v38  ;;  %v281_v52 = vmul.f32 0.00390625, %v259_v44  ;;  %v262_v53 = vpop.xlane.xlu1 %261  ;;  %v583_v44 = vsub.s32 0, %v1360_v11 }
  0xdb   : > { %v282_v54 = vmul.f32 0.00390625, %v262_v53  ;;  %v399_v57 = vsel %vm398_vm11, %v397_v39, %v392_v47 }
  0xdc   : > { %v404_v55 = vrot.slane %v281_v52, %v403_v29 }
  0xdd   : > { %v411_v58 = vrot.slane %v282_v54, %v410_v45  ;;  %v265_v59 = vpop.xlane.xlu0 %264 }
  0xde   : > { %v406_v61 = vsel %vm405_vm12, %v404_v55, %v399_v57  ;;  %v283_v62 = vmul.f32 0.00390625, %v265_v59  ;;  %v268_v63 = vpop.xlane.xlu1 %267 }
  0xdf   : > { %v284_v3 = vmul.f32 0.00390625, %v268_v63  ;;  %v413_v16 = vsel %vm412_vm13, %v411_v58, %v406_v61 }
  0xe0   : > { %v418_v10 = vrot.slane %v283_v62, %v417_v56 }
  0xe1   : > { %v425_v7 = vrot.slane %v284_v3, %v424_v60 }
  0xe2   : > { %v420_v17 = vsel %vm419_vm14, %v418_v10, %v413_v16 }
  0xe3   : > { %v427_v22 = vsel %vm426_vm15, %v425_v7, %v420_v17 }
  0xe4   : > { %869 = vmatmul.mubr.f32.vlgmr.msra.gmra.mxu0 %v427_v22 }
 0x1a4   : > { %v495_v28 = vpop.f32.mrf.mxu0 }
 0x1a5   : > { %v499_v30 = vmax.f32 %v495_v28, 0.0 }
 0x1a6   : > { %v870_v31 = vpop.f32.mrf.mxu0 }
 0x1a7   : > { %874 = vmatmul.mubr.msk.f32.vlgmr.msra.gmra.mxu1 %vm501_vm0, %v499_v30 }
 0x267   : > { %v571_v36 = vpop.f32.mrf.mxu1 }
 0x268   : > { %v809_v29 = vmul.f32 -1.442695, %v571_v36 }
 0x269   : > { %v875_v37 = vpop.f32.mrf.mxu1 }
 0x26a   : > { %928 = vpow2.f32 %v809_v29 }
 0x277   : > { %v929_v38 = vpop.eup %928 }
 0x278   : > { %v578_v39 = vadd.f32 1.0, %v929_v38 }
 0x27a   : > { %930 = vrcp.f32 %v578_v39 }
 0x287   : > { %v931_v45 = vpop.eup %930 }
 0x288   : > { %v584_v46 = vrot.slane %v931_v45, %v583_v44 }
 0x28a   : > { %590 = vbcast.lane.b32.xlu1 %v584_v46, 264  ;;  %586 = vbcast.lane.b32.xlu0 %v584_v46, 256 }
 0x28e   : > { %594 = vbcast.lane.b32.xlu1 %v584_v46, 272  ;;  %602 = vbcast.lane.b32.xlu0 %v584_v46, 288 }
 0x292   : > { %598 = vbcast.lane.b32.xlu1 %v584_v46, 280  ;;  %610 = vbcast.lane.b32.xlu0 %v584_v46, 304 }
 0x296   : > { %606 = vbcast.lane.b32.xlu1 %v584_v46, 296  ;;  %618 = vbcast.lane.b32.xlu0 %v584_v46, 320 }
 0x29a   : > { %614 = vbcast.lane.b32.xlu1 %v584_v46, 312  ;;  %626 = vbcast.lane.b32.xlu0 %v584_v46, 336 }
 0x29e   : > { %622 = vbcast.lane.b32.xlu1 %v584_v46, 328  ;;  %634 = vbcast.lane.b32.xlu0 %v584_v46, 352 }
 0x2a2   : > { %630 = vbcast.lane.b32.xlu1 %v584_v46, 344  ;;  %642 = vbcast.lane.b32.xlu0 %v584_v46, 368 }
 0x2a6   : > { %638 = vbcast.lane.b32.xlu1 %v584_v46, 360 }
 0x2aa   : > { %646 = vbcast.lane.b32.xlu1 %v584_v46, 376 }
 0x2fc   : > { %v591_v11 = vpop.permute.xlu1 %590  ;;  %v587_v47 = vpop.permute.xlu0 %586 }
 0x2fd   : > { %v650_v52 = vmul.f32 %v591_v11, %v1178_v5  ;;  %v651_v53 = vmul.f32 %v591_v11, %v1181_v6  ;;  %v648_v54 = vmul.f32 %v587_v47, %v1164_v0  ;;  %v649_v55 = vmul.f32 %v587_v47, %v1167_v1 }
 0x2ff   : > { %682 = vst [vmem:[%s1405_s6 + $0x10] sm:$0xff] %v650_v52  ;;  %683 = vst [vmem:[%s1405_s6 + $0x18] sm:$0xff] %v651_v53 }
 0x300   : > { %680 = vst [vmem:[%s1405_s6] sm:$0xff] %v648_v54  ;;  %681 = vst [vmem:[%s1405_s6 + $0x8] sm:$0xff] %v649_v55  ;;  %v595_v5 = vpop.permute.xlu1 %594  ;;  %v603_v0 = vpop.permute.xlu0 %602 }
 0x301   : > { %v652_v1 = vmul.f32 %v595_v5, %v1170_v2  ;;  %v653_v6 = vmul.f32 %v595_v5, %v1175_v4  ;;  %v656_v56 = vmul.f32 %v603_v0, %v1196_v12  ;;  %v657_v57 = vmul.f32 %v603_v0, %v1199_v13 }
 0x303   : > { %684 = vst [vmem:[%s1405_s6 + $0x20] sm:$0xff] %v652_v1  ;;  %685 = vst [vmem:[%s1405_s6 + $0x28] sm:$0xff] %v653_v6 }
 0x304   : > { %688 = vst [vmem:[%s1405_s6 + $0x40] sm:$0xff] %v656_v56  ;;  %689 = vst [vmem:[%s1405_s6 + $0x48] sm:$0xff] %v657_v57  ;;  %v599_v58 = vpop.permute.xlu1 %598  ;;  %v611_v59 = vpop.permute.xlu0 %610 }
 0x305   : > { %v654_v60 = vmul.f32 %v599_v58, %v1186_v8  ;;  %v655_v2 = vmul.f32 %v599_v58, %v1189_v9  ;;  %v660_v4 = vmul.f32 %v611_v59, %v1212_v18  ;;  %v661_v12 = vmul.f32 %v611_v59, %v1215_v19 }
 0x307   : > { %686 = vst [vmem:[%s1405_s6 + $0x30] sm:$0xff] %v654_v60  ;;  %687 = vst [vmem:[%s1405_s6 + $0x38] sm:$0xff] %v655_v2 }
 0x308   : > { %692 = vst [vmem:[%s1405_s6 + $0x60] sm:$0xff] %v660_v4  ;;  %693 = vst [vmem:[%s1405_s6 + $0x68] sm:$0xff] %v661_v12  ;;  %v607_v13 = vpop.permute.xlu1 %606  ;;  %v619_v61 = vpop.permute.xlu0 %618 }
 0x309   : > { %v658_v62 = vmul.f32 %v607_v13, %v1202_v14  ;;  %v659_v8 = vmul.f32 %v607_v13, %v1205_v15  ;;  %v664_v9 = vmul.f32 %v619_v61, %v1228_v24  ;;  %v665_v18 = vmul.f32 %v619_v61, %v1231_v25 }
 0x30b   : > { %690 = vst [vmem:[%s1405_s6 + $0x50] sm:$0xff] %v658_v62  ;;  %691 = vst [vmem:[%s1405_s6 + $0x58] sm:$0xff] %v659_v8 }
 0x30c   : > { %696 = vst [vmem:[%s1405_s6 + $0x80] sm:$0xff] %v664_v9  ;;  %697 = vst [vmem:[%s1405_s6 + $0x88] sm:$0xff] %v665_v18  ;;  %v615_v19 = vpop.permute.xlu1 %614  ;;  %v627_v63 = vpop.permute.xlu0 %626 }
 0x30d   : > { %v662_v3 = vmul.f32 %v615_v19, %v1218_v20  ;;  %v663_v14 = vmul.f32 %v615_v19, %v1221_v21  ;;  %v668_v15 = vmul.f32 %v627_v63, %v1248_v32  ;;  %v669_v24 = vmul.f32 %v627_v63, %v1251_v33 }
 0x30f   : > { %694 = vst [vmem:[%s1405_s6 + $0x70] sm:$0xff] %v662_v3  ;;  %695 = vst [vmem:[%s1405_s6 + $0x78] sm:$0xff] %v663_v14 }
 0x310   : > { %700 = vst [vmem:[%s1405_s6 + $0xa0] sm:$0xff] %v668_v15  ;;  %701 = vst [vmem:[%s1405_s6 + $0xa8] sm:$0xff] %v669_v24  ;;  %v623_v25 = vpop.permute.xlu1 %622  ;;  %v635_v10 = vpop.permute.xlu0 %634 }
 0x311   : > { %v666_v7 = vmul.f32 %v623_v25, %v1234_v26  ;;  %v667_v20 = vmul.f32 %v623_v25, %v1237_v27  ;;  %v672_v21 = vmul.f32 %v635_v10, %v1273_v40  ;;  %v673_v32 = vmul.f32 %v635_v10, %v1276_v41 }
 0x313   : > { %698 = vst [vmem:[%s1405_s6 + $0x90] sm:$0xff] %v666_v7  ;;  %699 = vst [vmem:[%s1405_s6 + $0x98] sm:$0xff] %v667_v20 }
 0x314   : > { %704 = vst [vmem:[%s1405_s6 + $0xc0] sm:$0xff] %v672_v21  ;;  %705 = vst [vmem:[%s1405_s6 + $0xc8] sm:$0xff] %v673_v32  ;;  %v631_v33 = vpop.permute.xlu1 %630  ;;  %v643_v16 = vpop.permute.xlu0 %642 }
 0x315   : > { %v670_v26 = vmul.f32 %v631_v33, %v1254_v34  ;;  %v671_v17 = vmul.f32 %v631_v33, %v1257_v35  ;;  %v676_v27 = vmul.f32 %v643_v16, %v1297_v48  ;;  %v677_v40 = vmul.f32 %v643_v16, %v1300_v49 }
 0x317   : > { %702 = vst [vmem:[%s1405_s6 + $0xb0] sm:$0xff] %v670_v26  ;;  %703 = vst [vmem:[%s1405_s6 + $0xb8] sm:$0xff] %v671_v17 }
 0x318   : > { %708 = vst [vmem:[%s1405_s6 + $0xe0] sm:$0xff] %v676_v27  ;;  %709 = vst [vmem:[%s1405_s6 + $0xe8] sm:$0xff] %v677_v40  ;;  %v639_v41 = vpop.permute.xlu1 %638 }
 0x319   : > { %v674_v22 = vmul.f32 %v639_v41, %v1279_v42  ;;  %v675_v23 = vmul.f32 %v639_v41, %v1282_v43 }
 0x31b   : > { %706 = vst [vmem:[%s1405_s6 + $0xd0] sm:$0xff] %v674_v22  ;;  %707 = vst [vmem:[%s1405_s6 + $0xd8] sm:$0xff] %v675_v23 }
 0x31c   : > { %v647_v34 = vpop.permute.xlu1 %646 }
 0x31d   : > { %v678_v35 = vmul.f32 %v647_v34, %v1303_v50  ;;  %v679_v42 = vmul.f32 %v647_v34, %v1306_v51 }
 0x31f   : > { %710 = vst [vmem:[%s1405_s6 + $0xf0] sm:$0xff] %v678_v35  ;;  %711 = vst [vmem:[%s1405_s6 + $0xf8] sm:$0xff] %v679_v42 }
 0x320   : > { %973 = shalt.err (!%p970_p10)
}
 0x321   : > { %s974_s28 = scalar_lea.hbm %s1468_s19, 4096  ;;  %s978_s10 = scalar_lea.hbm %s1520_s3, 8192 }
 0x322   : > { %p975_p0 = scmp.ne.s32.totalorder %s1468_s19, %s974_s28  ;;  %p979_p1 = scmp.lt.s32.totalorder %s1468_s19, %s1520_s3 }
 0x323   : > { %p980_p3 = scmp.lt.s32.totalorder %s978_s10, %s974_s28 }
 0x324   : > { %p976_p2 = pnand %p975_p0, %p1529_p12 }
 0x325   : > { %p981_p6 = por %p980_p3, %p979_p1 }
 0x326   : > { %p977_p9 = pneg %p976_p2 }
 0x328   : > { %p982_p11 = pnand %p981_p6, %p977_p9 }
 0x32a   : > { %985 = shalt.err (!%p982_p11)
}
 0x32b   : > { %s1032_s4 = smov 256   ;;  %s1033_s6 = smov 16  }
 0x32c   : > { %878 = dma.vmem_to_hbm [thread:$0]  (%p1529_p12), %s1470_s7, 4096, %s1468_s19, %s713_s16, %s1032_s4, %s1032_s4, %s1033_s6  }
 0x32d PF: > { %s741_s9 = sand.u32 1, %s1012_s12   ;;  %p1530_p13 = scmp.ne.s32.totalorder %s1526_s25, 0 }
 0x32e   : > { %p1531_p4 = scmp.ge.s32.totalorder %s1024_s15, 2  ;;  %s742_s8 = scalar_lea.sflag [#allocation4], %s741_s9 }
 0x330   : > { %p885_p5 = pnand %p1531_p4, %p1530_p13 }
 0x332   : > { %p886_p7 = pneg %p885_p5 }
 0x334   : > { %1007 = dma.done.wait (%p886_p7), %s742_s8, 4096  }
 0x335   : > { %1009 = vsyncadd (%p886_p7), %s742_s8, 4294963200  ;;  %p16_p8 = scmp.ge.s32.totalorder %s1079_s18, 4   ;;  %s1532_s12 = smov %s1016_s13 }
 0x336   : > { %s1533_s13 = smov %s1020_s14  ;;  %s1534_s14 = smov %s1091_s21 }
 0x337   : > { %s1535_s15 = smov %s1079_s18  ;;  %18 = sbr.rel (!%p16_p8) target bundleno = 5 (0x5), region = 77 }
 0x33c   :  { %747 = vsyncpa [#allocation3], 1 }
 0x33d   :  { %749 = vsyncpa [#allocation3 + $0x1], 1 }
 0x33e   :  { %750 = vsyncpa [#allocation4], 1 }
 0x33f   :  { %752 = vsyncpa [#allocation4 + $0x1], 1 }

</bundles_post_ra>
